<compile_context>
chip_gen: v6e
topology: v6e:2x2x1
jax: 0.10.0
libtpu: 0.0.40
codegen_flags: <defaults>
</compile_context>

<pallas_src>
import functools

import jax
import jax.numpy as jnp
from jax.experimental import pallas as pl
from jax.experimental.pallas import tpu as pltpu


def _round_up(x, m):
    return (x + m - 1) // m * m


def _encoder_kernel(x_ref, w1_ref, b1_ref, w2_ref, b2_ref, g_ref, beta_ref,
                    o_ref, xcur_ref, acc_ref, *, eps):
    """Grid = (row_tile i, sublayer l, F-chunk k).

    x_ref    : (tm, D)      input rows (loaded once per row tile)
    w1_ref   : (1, D, tk)   W1 chunk of sublayer l
    b1_ref   : (1, 1, tk)   b1 chunk
    w2_ref   : (1, tk, D)   W2 chunk
    b2_ref   : (1, 1, D)    b2
    g_ref    : (1, 1, D)    LayerNorm gamma
    beta_ref : (1, 1, D)    LayerNorm beta
    o_ref    : (tm, D)      output rows (written once, on last l & k)
    xcur_ref : (tm, D) f32  resident activation (carried across l, k)
    acc_ref  : (tm, D) f32  FFN accumulator over k chunks
    """
    l = pl.program_id(1)
    k = pl.program_id(2)
    nl = pl.num_programs(1)
    nk = pl.num_programs(2)

    # New row tile: load the input into the resident f32 activation buffer.
    @pl.when((l == 0) & (k == 0))
    def _():
        xcur_ref[...] = x_ref[...].astype(jnp.float32)

    # New sublayer: reset the FFN accumulator.
    @pl.when(k == 0)
    def _():
        acc_ref[...] = jnp.zeros_like(acc_ref)

    x = xcur_ref[...]                                  # (tm, D) f32
    xm = x.astype(w1_ref.dtype)                        # feed MXU in weight dtype
    h = jnp.dot(xm, w1_ref[0], preferred_element_type=jnp.float32)
    h = jnp.maximum(h + b1_ref[0].astype(jnp.float32), 0.0)
    acc_ref[...] += jnp.dot(h.astype(w2_ref.dtype), w2_ref[0],
                            preferred_element_type=jnp.float32)

    # Last F-chunk: finish this sublayer (bias + residual + LayerNorm), f32 math.
    @pl.when(k == nk - 1)
    def _():
        y = x + acc_ref[...] + b2_ref[0].astype(jnp.float32)
        mean = jnp.mean(y, axis=-1, keepdims=True)
        mean2 = jnp.mean(y * y, axis=-1, keepdims=True)
        var = jnp.maximum(mean2 - mean * mean, 0.0)
        yn = (y - mean) * jax.lax.rsqrt(var + eps)
        xcur_ref[...] = (yn * g_ref[0].astype(jnp.float32)
                         + beta_ref[0].astype(jnp.float32))

    # Last sublayer, last chunk: emit the output tile.
    @pl.when((l == nl - 1) & (k == nk - 1))
    def _():
        o_ref[...] = xcur_ref[...].astype(o_ref.dtype)


def encoder_layer_forward(x, params, *, tm=256, tk=512, eps=1e-5):
    """x: (B, S, D). params: list of per-sublayer dicts (stackable shapes)."""
    B, S, D = x.shape
    L = len(params)
    N = B * S
    F = params[0]["w1"].shape[1]

    # Stack per-sublayer weights so the whole EncoderLayer runs in ONE pallas_call.
    w1 = jnp.stack([p["w1"] for p in params])                 # (L, D, F)
    b1 = jnp.stack([p["b1"] for p in params])[:, None, :]     # (L, 1, F)
    w2 = jnp.stack([p["w2"] for p in params])                 # (L, F, D)
    b2 = jnp.stack([p["b2"] for p in params])[:, None, :]     # (L, 1, D)
    g = jnp.stack([p["gamma"] for p in params])[:, None, :]   # (L, 1, D)
    bt = jnp.stack([p["beta"] for p in params])[:, None, :]   # (L, 1, D)

    # Row tile: large enough to fill the MXU M dim; clamp + zero-pad for small inputs.
    tm_eff = min(tm, _round_up(N, 8))
    n_pad = _round_up(N, tm_eff)
    x2d = x.reshape(N, D)
    if n_pad != N:
        x2d = jnp.pad(x2d, ((0, n_pad - N), (0, 0)))

    # K-tile the FFN hidden dim (keeps weight residency small; required on v7x VMEM).
    if tk > F or F % tk != 0:
        tk = F
    nk = F // tk

    kernel = functools.partial(_encoder_kernel, eps=eps)

    # Explicit VMEM budget (double-buffered pipelined blocks + scratch), with headroom,
    # capped below v7x's 64 MiB physical VMEM.
    bx = x2d.dtype.itemsize
    bw = w1.dtype.itemsize
    est = (2 * tm_eff * D * bx            # x tile (double-buffered)
           + 2 * tm_eff * D * bx          # out tile
           + 2 * tm_eff * D * 4           # f32 scratch (xcur + acc)
           + 2 * 2 * D * tk * bw          # W1 + W2 chunks (double-buffered)
           + 2 * (tk + 3 * D) * bw)       # b1 chunk, b2, gamma, beta
    vmem_limit = int(min(max(2 * est, 32 << 20), 64 << 20))

    grid_spec = pltpu.PrefetchScalarGridSpec(
        num_scalar_prefetch=0,
        grid=(n_pad // tm_eff, L, nk),
        in_specs=[
            pl.BlockSpec((tm_eff, D), lambda i, l, k: (i, 0)),     # x tile
            pl.BlockSpec((1, D, tk), lambda i, l, k: (l, 0, k)),   # W1 chunk
            pl.BlockSpec((1, 1, tk), lambda i, l, k: (l, 0, k)),   # b1 chunk
            pl.BlockSpec((1, tk, D), lambda i, l, k: (l, k, 0)),   # W2 chunk
            pl.BlockSpec((1, 1, D), lambda i, l, k: (l, 0, 0)),    # b2
            pl.BlockSpec((1, 1, D), lambda i, l, k: (l, 0, 0)),    # gamma
            pl.BlockSpec((1, 1, D), lambda i, l, k: (l, 0, 0)),    # beta
        ],
        out_specs=pl.BlockSpec((tm_eff, D), lambda i, l, k: (i, 0)),
        scratch_shapes=[
            pltpu.VMEM((tm_eff, D), jnp.float32),   # resident activation
            pltpu.VMEM((tm_eff, D), jnp.float32),   # FFN accumulator
        ],
    )

    out2d = pl.pallas_call(
        kernel,
        out_shape=jax.ShapeDtypeStruct((n_pad, D), x.dtype),
        grid_spec=grid_spec,
        compiler_params=pltpu.CompilerParams(
            dimension_semantics=("parallel", "arbitrary", "arbitrary"),
            vmem_limit_bytes=vmem_limit,
        ),
    )(x2d, w1, b1, w2, b2, g, bt)

    return out2d[:N].reshape(B, S, D)


def encoder_layer_reference(x, params, eps=1e-5):
    """Pure-JAX reference matching the PyTorch forward (eval mode)."""
    for p in params:
        h = jnp.maximum(x @ p["w1"] + p["b1"], 0.0) @ p["w2"] + p["b2"]
        y = x + h
        mean = jnp.mean(y, axis=-1, keepdims=True)
        var = jnp.mean((y - mean) ** 2, axis=-1, keepdims=True)
        x = (y - mean) / jnp.sqrt(var + eps) * p["gamma"] + p["beta"]
    return x


def make_params(key, d_model, d_ff, n_sublayers, dtype=jnp.float32):
    params = []
    for i in range(n_sublayers):
        k1, k2, key = jax.random.split(jax.random.fold_in(key, i), 3)
        params.append(dict(
            w1=(jax.random.normal(k1, (d_model, d_ff), jnp.float32) * 0.05).astype(dtype),
            b1=jnp.zeros((d_ff,), dtype),
            w2=(jax.random.normal(k2, (d_ff, d_model), jnp.float32) * 0.05).astype(dtype),
            b2=jnp.zeros((d_model,), dtype),
            gamma=jnp.ones((d_model,), dtype),    # nn.LayerNorm init
            beta=jnp.zeros((d_model,), dtype),
        ))
    return params


if __name__ == "__main__":
    # Small test shapes (f32 so the reference comparison is tight). For real models use
    # bf16 params, d_model a multiple of 128, and tm=256..512 / tk=512.
    B, S, D, F = 2, 8, 32, 64
    n_sublayers = 2

    key = jax.random.PRNGKey(0)
    kx, kp = jax.random.split(key)
    x = jax.random.normal(kx, (B, S, D), jnp.float32)
    params = make_params(kp, D, F, n_sublayers)

    out = encoder_layer_forward(x, params, tm=256, tk=512)
    out = jax.block_until_ready(out)

    ref = encoder_layer_reference(x, params)
    assert out.shape == (B, S, D)
    assert jnp.allclose(out, ref, atol=1e-4, rtol=1e-4), "mismatch vs reference"

    # TODO(synk): Dropout(p=0.1) is identity here (eval mode); training-mode dropout would
    # need pltpu.prng_seed + stateful_bernoulli inside the kernel.
    print("KERNEL_OK")
</pallas_src>

<mosaic_0001>
module attributes {stable_mosaic.version = 11 : i64} {
  func.func @_encoder_kernel(%arg0: i32, %arg1: i32, %arg2: i32, %arg3: memref<16x32xf32, #tpu.memory_space<vmem>>, %arg4: memref<1x32x64xf32, #tpu.memory_space<vmem>>, %arg5: memref<1x1x64xf32, #tpu.memory_space<vmem>>, %arg6: memref<1x64x32xf32, #tpu.memory_space<vmem>>, %arg7: memref<1x1x32xf32, #tpu.memory_space<vmem>>, %arg8: memref<1x1x32xf32, #tpu.memory_space<vmem>>, %arg9: memref<1x1x32xf32, #tpu.memory_space<vmem>>, %arg10: memref<16x32xf32, #tpu.memory_space<vmem>>, %arg11: memref<16x32xf32, #tpu.memory_space<vmem>>, %arg12: memref<16x32xf32, #tpu.memory_space<vmem>>) attributes {dimension_semantics = [#tpu.dimension_semantics<parallel>, #tpu.dimension_semantics<arbitrary>, #tpu.dimension_semantics<arbitrary>], iteration_bounds = array<i64: 1, 2, 1>, scalar_prefetch = 0 : i64, scratch_operands = 2 : i64, tpu.core_type = #tpu.core_type<tc>, window_params = [{transform_indices = @transform_0, window_bounds = array<i64: 16, 32>}, {transform_indices = @transform_1, window_bounds = array<i64: 1, 32, 64>}, {transform_indices = @transform_2, window_bounds = array<i64: 1, 1, 64>}, {transform_indices = @transform_3, window_bounds = array<i64: 1, 64, 32>}, {transform_indices = @transform_4, window_bounds = array<i64: 1, 1, 32>}, {transform_indices = @transform_5, window_bounds = array<i64: 1, 1, 32>}, {transform_indices = @transform_6, window_bounds = array<i64: 1, 1, 32>}, {transform_indices = @transform_7, window_bounds = array<i64: 16, 32>}]} {
    %c0_i32 = arith.constant 0 : i32
    %0 = arith.cmpi eq, %arg1, %c0_i32 : i32
    %c0_i32_0 = arith.constant 0 : i32
    %1 = arith.cmpi eq, %arg2, %c0_i32_0 : i32
    %2 = arith.andi %0, %1 : i1
    %3 = arith.extui %2 : i1 to i32
    %c0_i32_1 = arith.constant 0 : i32
    %4 = arith.cmpi ne, %3, %c0_i32_1 : i32
    scf.if %4 {
      %c0_24 = arith.constant 0 : index
      %c0_25 = arith.constant 0 : index
      %32 = vector.load %arg3[%c0_24, %c0_25] : memref<16x32xf32, #tpu.memory_space<vmem>>, vector<16x32xf32>
      %c0_26 = arith.constant 0 : index
      %c0_27 = arith.constant 0 : index
      %33 = vector.load %arg11[%c0_26, %c0_27] : memref<16x32xf32, #tpu.memory_space<vmem>>, vector<16x32xf32>
      tpu.vector_store %arg11[%c0_26, %c0_27], %32 {strides = array<i32>} : memref<16x32xf32, #tpu.memory_space<vmem>>, vector<16x32xf32>,
    } else {
    }
    %c0_i32_2 = arith.constant 0 : i32
    %5 = arith.cmpi eq, %arg2, %c0_i32_2 : i32
    %6 = arith.extui %5 : i1 to i32
    %c0_i32_3 = arith.constant 0 : i32
    %7 = arith.cmpi ne, %6, %c0_i32_3 : i32
    scf.if %7 {
      %cst_24 = arith.constant 0.000000e+00 : f32
      %32 = vector.broadcast %cst_24 : f32 to vector<16x32xf32>
      %c0_25 = arith.constant 0 : index
      %c0_26 = arith.constant 0 : index
      %33 = vector.load %arg12[%c0_25, %c0_26] : memref<16x32xf32, #tpu.memory_space<vmem>>, vector<16x32xf32>
      tpu.vector_store %arg12[%c0_25, %c0_26], %32 {strides = array<i32>} : memref<16x32xf32, #tpu.memory_space<vmem>>, vector<16x32xf32>,
    } else {
    }
    %c0 = arith.constant 0 : index
    %c0_4 = arith.constant 0 : index
    %8 = vector.load %arg11[%c0, %c0_4] : memref<16x32xf32, #tpu.memory_space<vmem>>, vector<16x32xf32>
    %c0_5 = arith.constant 0 : index
    %c0_6 = arith.constant 0 : index
    %c0_7 = arith.constant 0 : index
    %9 = vector.load %arg4[%c0_5, %c0_6, %c0_7] : memref<1x32x64xf32, #tpu.memory_space<vmem>>, vector<1x32x64xf32>
    %10 = vector.shape_cast %9 : vector<1x32x64xf32> to vector<32x64xf32>
    %cst = arith.constant dense<0.000000e+00> : vector<16x64xf32>
    %11 = tpu.matmul %8, %10, %cst {dimension_numbers = #tpu.dot_dimension_numbers<[1], [0], [0], [1], [0, 0, 1, 1], [], []>} : vector<16x32xf32>, vector<32x64xf32>, vector<16x64xf32> -> vector<16x64xf32>
    %c0_8 = arith.constant 0 : index
    %c0_9 = arith.constant 0 : index
    %c0_10 = arith.constant 0 : index
    %12 = vector.load %arg5[%c0_8, %c0_9, %c0_10] : memref<1x1x64xf32, #tpu.memory_space<vmem>>, vector<1x1x64xf32>
    %13 = vector.shape_cast %12 : vector<1x1x64xf32> to vector<1x64xf32>
    %14 = vector.broadcast %13 : vector<1x64xf32> to vector<16x64xf32>
    %15 = arith.addf %11, %14 : vector<16x64xf32>
    %cst_11 = arith.constant 0.000000e+00 : f32
    %16 = vector.broadcast %cst_11 : f32 to vector<16x64xf32>
    %17 = arith.maximumf %15, %16 : vector<16x64xf32>
    %c0_12 = arith.constant 0 : index
    %c0_13 = arith.constant 0 : index
    %18 = vector.load %arg12[%c0_12, %c0_13] : memref<16x32xf32, #tpu.memory_space<vmem>>, vector<16x32xf32>
    %c0_14 = arith.constant 0 : index
    %c0_15 = arith.constant 0 : index
    %c0_16 = arith.constant 0 : index
    %19 = vector.load %arg6[%c0_14, %c0_15, %c0_16] : memref<1x64x32xf32, #tpu.memory_space<vmem>>, vector<1x64x32xf32>
    %20 = vector.shape_cast %19 : vector<1x64x32xf32> to vector<64x32xf32>
    %cst_17 = arith.constant dense<0.000000e+00> : vector<16x32xf32>
    %21 = tpu.matmul %17, %20, %cst_17 {dimension_numbers = #tpu.dot_dimension_numbers<[1], [0], [0], [1], [0, 0, 1, 1], [], []>} : vector<16x64xf32>, vector<64x32xf32>, vector<16x32xf32> -> vector<16x32xf32>
    %22 = arith.addf %18, %21 : vector<16x32xf32>
    %c0_18 = arith.constant 0 : index
    %c0_19 = arith.constant 0 : index
    %23 = vector.load %arg12[%c0_18, %c0_19] : memref<16x32xf32, #tpu.memory_space<vmem>>, vector<16x32xf32>
    tpu.vector_store %arg12[%c0_18, %c0_19], %22 {strides = array<i32>} : memref<16x32xf32, #tpu.memory_space<vmem>>, vector<16x32xf32>,
    %c0_i32_20 = arith.constant 0 : i32
    %24 = arith.cmpi eq, %arg2, %c0_i32_20 : i32
    %25 = arith.extui %24 : i1 to i32
    %c0_i32_21 = arith.constant 0 : i32
    %26 = arith.cmpi ne, %25, %c0_i32_21 : i32
    scf.if %26 {
      %c0_24 = arith.constant 0 : index
      %c0_25 = arith.constant 0 : index
      %32 = vector.load %arg12[%c0_24, %c0_25] : memref<16x32xf32, #tpu.memory_space<vmem>>, vector<16x32xf32>
      %33 = arith.addf %8, %32 : vector<16x32xf32>
      %c0_26 = arith.constant 0 : index
      %c0_27 = arith.constant 0 : index
      %c0_28 = arith.constant 0 : index
      %34 = vector.load %arg7[%c0_26, %c0_27, %c0_28] : memref<1x1x32xf32, #tpu.memory_space<vmem>>, vector<1x1x32xf32>
      %35 = vector.shape_cast %34 : vector<1x1x32xf32> to vector<1x32xf32>
      %36 = vector.broadcast %35 : vector<1x32xf32> to vector<16x32xf32>
      %37 = arith.addf %33, %36 : vector<16x32xf32>
      %cst_29 = arith.constant dense<0.000000e+00> : vector<16xf32>
      %38 = vector.multi_reduction <add>, %37, %cst_29 [1] : vector<16x32xf32> to vector<16xf32>
      %39 = vector.shape_cast %38 : vector<16xf32> to vector<16x1xf32>
      %cst_30 = arith.constant 3.200000e+01 : f32
      %40 = vector.broadcast %cst_30 : f32 to vector<16x1xf32>
      %41 = arith.divf %39, %40 : vector<16x1xf32>
      %42 = arith.mulf %37, %37 : vector<16x32xf32>
      %cst_31 = arith.constant dense<0.000000e+00> : vector<16xf32>
      %43 = vector.multi_reduction <add>, %42, %cst_31 [1] : vector<16x32xf32> to vector<16xf32>
      %44 = vector.shape_cast %43 : vector<16xf32> to vector<16x1xf32>
      %cst_32 = arith.constant 3.200000e+01 : f32
      %45 = vector.broadcast %cst_32 : f32 to vector<16x1xf32>
      %46 = arith.divf %44, %45 : vector<16x1xf32>
      %47 = arith.mulf %41, %41 : vector<16x1xf32>
      %48 = arith.subf %46, %47 : vector<16x1xf32>
      %cst_33 = arith.constant 0.000000e+00 : f32
      %49 = vector.broadcast %cst_33 : f32 to vector<16x1xf32>
      %50 = arith.maximumf %48, %49 : vector<16x1xf32>
      %51 = vector.broadcast %41 : vector<16x1xf32> to vector<16x32xf32>
      %52 = arith.subf %37, %51 : vector<16x32xf32>
      %cst_34 = arith.constant 9.99999974E-6 : f32
      %53 = vector.broadcast %cst_34 : f32 to vector<16x1xf32>
      %54 = arith.addf %50, %53 : vector<16x1xf32>
      %55 = math.rsqrt %54 : vector<16x1xf32>
      %56 = vector.broadcast %55 : vector<16x1xf32> to vector<16x32xf32>
      %57 = arith.mulf %52, %56 : vector<16x32xf32>
      %c0_35 = arith.constant 0 : index
      %c0_36 = arith.constant 0 : index
      %c0_37 = arith.constant 0 : index
      %58 = vector.load %arg8[%c0_35, %c0_36, %c0_37] : memref<1x1x32xf32, #tpu.memory_space<vmem>>, vector<1x1x32xf32>
      %59 = vector.shape_cast %58 : vector<1x1x32xf32> to vector<1x32xf32>
      %60 = vector.broadcast %59 : vector<1x32xf32> to vector<16x32xf32>
      %61 = arith.mulf %57, %60 : vector<16x32xf32>
      %c0_38 = arith.constant 0 : index
      %c0_39 = arith.constant 0 : index
      %c0_40 = arith.constant 0 : index
      %62 = vector.load %arg9[%c0_38, %c0_39, %c0_40] : memref<1x1x32xf32, #tpu.memory_space<vmem>>, vector<1x1x32xf32>
      %63 = vector.shape_cast %62 : vector<1x1x32xf32> to vector<1x32xf32>
      %64 = vector.broadcast %63 : vector<1x32xf32> to vector<16x32xf32>
      %65 = arith.addf %61, %64 : vector<16x32xf32>
      %c0_41 = arith.constant 0 : index
      %c0_42 = arith.constant 0 : index
      %66 = vector.load %arg11[%c0_41, %c0_42] : memref<16x32xf32, #tpu.memory_space<vmem>>, vector<16x32xf32>
      tpu.vector_store %arg11[%c0_41, %c0_42], %65 {strides = array<i32>} : memref<16x32xf32, #tpu.memory_space<vmem>>, vector<16x32xf32>,
    } else {
    }
    %c1_i32 = arith.constant 1 : i32
    %27 = arith.cmpi eq, %arg1, %c1_i32 : i32
    %c0_i32_22 = arith.constant 0 : i32
    %28 = arith.cmpi eq, %arg2, %c0_i32_22 : i32
    %29 = arith.andi %27, %28 : i1
    %30 = arith.extui %29 : i1 to i32
    %c0_i32_23 = arith.constant 0 : i32
    %31 = arith.cmpi ne, %30, %c0_i32_23 : i32
    scf.if %31 {
      %c0_24 = arith.constant 0 : index
      %c0_25 = arith.constant 0 : index
      %32 = vector.load %arg11[%c0_24, %c0_25] : memref<16x32xf32, #tpu.memory_space<vmem>>, vector<16x32xf32>
      %c0_26 = arith.constant 0 : index
      %c0_27 = arith.constant 0 : index
      %33 = vector.load %arg10[%c0_26, %c0_27] : memref<16x32xf32, #tpu.memory_space<vmem>>, vector<16x32xf32>
      tpu.vector_store %arg10[%c0_26, %c0_27], %32 {strides = array<i32>} : memref<16x32xf32, #tpu.memory_space<vmem>>, vector<16x32xf32>,
    } else {
    }
    return
  }
  func.func @transform_0(%arg0: i32, %arg1: i32, %arg2: i32) -> (i32, i32) {
    %c0_i32 = arith.constant 0 : i32
    %c0_i32_0 = arith.constant 0 : i32
    return %arg0, %c0_i32 : i32, i32
  }
  func.func @transform_1(%arg0: i32, %arg1: i32, %arg2: i32) -> (i32, i32, i32) {
    %c0_i32 = arith.constant 0 : i32
    %c0_i32_0 = arith.constant 0 : i32
    return %arg1, %c0_i32, %arg2 : i32, i32, i32
  }
  func.func @transform_2(%arg0: i32, %arg1: i32, %arg2: i32) -> (i32, i32, i32) {
    %c0_i32 = arith.constant 0 : i32
    %c0_i32_0 = arith.constant 0 : i32
    return %arg1, %c0_i32, %arg2 : i32, i32, i32
  }
  func.func @transform_3(%arg0: i32, %arg1: i32, %arg2: i32) -> (i32, i32, i32) {
    %c0_i32 = arith.constant 0 : i32
    %c0_i32_0 = arith.constant 0 : i32
    return %arg1, %arg2, %c0_i32 : i32, i32, i32
  }
  func.func @transform_4(%arg0: i32, %arg1: i32, %arg2: i32) -> (i32, i32, i32) {
    %c0_i32 = arith.constant 0 : i32
    %c0_i32_0 = arith.constant 0 : i32
    %c0_i32_1 = arith.constant 0 : i32
    return %arg1, %c0_i32, %c0_i32_0 : i32, i32, i32
  }
  func.func @transform_5(%arg0: i32, %arg1: i32, %arg2: i32) -> (i32, i32, i32) {
    %c0_i32 = arith.constant 0 : i32
    %c0_i32_0 = arith.constant 0 : i32
    %c0_i32_1 = arith.constant 0 : i32
    return %arg1, %c0_i32, %c0_i32_0 : i32, i32, i32
  }
  func.func @transform_6(%arg0: i32, %arg1: i32, %arg2: i32) -> (i32, i32, i32) {
    %c0_i32 = arith.constant 0 : i32
    %c0_i32_0 = arith.constant 0 : i32
    %c0_i32_1 = arith.constant 0 : i32
    return %arg1, %c0_i32, %c0_i32_0 : i32, i32, i32
  }
  func.func @transform_7(%arg0: i32, %arg1: i32, %arg2: i32) -> (i32, i32) {
    %c0_i32 = arith.constant 0 : i32
    %c0_i32_0 = arith.constant 0 : i32
    return %arg0, %c0_i32 : i32, i32
  }
}

</mosaic_0001>

<bundles_post_ra>
// kernel: tpu_custom_call.1
= control target key start
LH: loop header
LB: loop body
LE: loop exit
PB: predicated region body
PF: predicated region fallthrough
CT: control target
= control target key end

     0   :  { %12 = vsyncpa [#allocation5], 0  ;;  %s1064_s24 = smov 0   ;;  %s1066_s25 = smov 0   ;;  %s1193_s0 = inlined_call_operand.vmem [shape: f32[16,32], index: 0, kind: input, shape index: {}]   ;;  %s1194_s1 = inlined_call_operand.vmem [shape: f32[2,32,64], index: 1, kind: input, shape index: {}]   ;;  %s1195_s2 = inlined_call_operand.vmem [shape: f32[2,1,64], index: 2, kind: input, shape index: {}]   ;;  %s1196_s3 = inlined_call_operand.vmem [shape: f32[2,64,32], index: 3, kind: input, shape index: {}]   ;;  %s1197_s4 = inlined_call_operand.vmem [shape: f32[2,1,32], index: 4, kind: input, shape index: {}]   ;;  %s1198_s5 = inlined_call_operand.vmem [shape: f32[2,1,32], index: 5, kind: input, shape index: {}]   ;;  %s1199_s6 = inlined_call_operand.vmem [shape: f32[2,1,32], index: 6, kind: input, shape index: {}]   ;;  %s1200_s7 = inlined_call_operand.hbm [shape: f32[16,32], index: 7, kind: output, shape index: {}]  }
   0x1   :  { %s1068_s26 = smov 0  }
   0x2 LB: > { %s33_s28 = sadd.s32 1, %s1014_s25  ;;  %p861_p1 = scmp.ge.s32.totalorder %s1018_s26, 1  ;;  %s1018_s26 = sphi %s1068_s26, %s18_s26   ;;  %s1014_s25 = sphi %s1066_s25, %s1204_s25   ;;  %s1010_s24 = sphi %s1064_s24, %s1203_s24  }
   0x3   : > { %p35_p0 = scmp.ge.s32.totalorder %s33_s28, 2  ;;  %p327_p2 = scmp.lt.s32.totalorder %s1018_s26, 3 }
   0x5   : > { %s1206_s28 = smov (%p35_p0, %s33_s28), 0  ;;  %p328_p3 = pnand %p861_p1, %p327_p2 }
   0x6   : > { %p392_p4 = scmp.lt.s32.totalorder (!%p328_p3), %s1010_s24, 1  ;;  %p426_p5 = scmp.eq.s32.totalorder (!%p328_p3), %s1010_s24, 0 }
   0x7   : > { %331 = sbr.rel (%p328_p3) target bundleno = 634 (0x27a), region = 48 }
   0xc   : > { %s1088_s29 = scalar_select %p392_p4, %s1010_s24, 1  ;;  %v432_v0 = vld [vmem:[%s1193_s0] sm:$0xff] (%p426_p5)  ;;  %vm434_vm0 = vcmask (%p426_p5), 261120   ;;  %v433_v1 = vld [vmem:[%s1193_s0 + $0x8] sm:$0xff] (%p426_p5) }
   0xd   : > { %431 = sbr.rel (!%p426_p5) target bundleno = 18 (0x12), region = 52  ;;  %435 = vst.msk [vmem:[#allocation2] sm:$0xff] (%p426_p5), %vm434_vm0, %v432_v0  ;;  %436 = vst.msk [vmem:[#allocation2 + $0x8] sm:$0xff] (%p426_p5), %vm434_vm0, %v433_v1 }
   0xe   : > { %s880_s30 = sshll.u32 %s1088_s29, 5  ;;  %s405_s10 = scalar_lea.vmem %s1195_s2, %s1088_s29 }
   0xf   : > { %s399_s13 = scalar_lea.vmem %s1194_s1, %s880_s30  ;;  %s881_s14 = sshll.u32 %s1088_s29, 6 }
  0x10   : > { %s1102_s17 = scalar_lea.vmem %s1196_s3, %s881_s14  ;;  %s418_s20 = scalar_lea.vmem %s1197_s4, %s1088_s29 }
  0x11   : > { %s421_s23 = scalar_lea.vmem %s1198_s5, %s1088_s29  ;;  %s424_s27 = scalar_lea.vmem %s1199_s6, %s1088_s29 }
  0x12 PF: > { %v448_v2 = vld [vmem:[%s399_s13 + $0x18] sm:$0xff]  ;;  %v447_v3 = vld [vmem:[%s399_s13 + $0x10] sm:$0xff]  ;;  %vm440_vm1 = vcmask 261120   ;;  %v446_v5 = vld [vmem:[%s399_s13 + $0x8] sm:$0xff]  ;;  %v1020_v16 = vmov 0.0   ;;  %vm550_vm2 = vcmask 523264  }
  0x13   : > { %900 = vmatprep.subr.mxu0 %v448_v2  ;;  %v549_v6 = vld [vmem:[%s1102_s17 + $0x38] sm:$0xff]  ;;  %v548_v7 = vld [vmem:[%s1102_s17 + $0x30] sm:$0xff]  ;;  %v445_v8 = vld [vmem:[%s399_s13] sm:$0xff]  ;;  %442 = vst.msk [vmem:[#allocation3 + $0x8] sm:$0xff] %vm440_vm1, %v1020_v16  ;;  %p705_p6 = scmp.eq.s32.totalorder %s1010_s24, 1 }
  0x14   : > { %v443_v4 = vld [vmem:[#allocation2] sm:$0xff]  ;;  %901 = vmatpush3.msra.mxu0 %v448_v2  ;;  %911 = vmatprep.subr.mxu1 %v549_v6  ;;  %v547_v9 = vld [vmem:[%s1102_s17 + $0x28] sm:$0xff]  ;;  %v545_v12 = vld [vmem:[%s1102_s17 + $0x18] sm:$0xff]  ;;  %441 = vst.msk [vmem:[#allocation3] sm:$0xff] %vm440_vm1, %v1020_v16 }
  0x15   : > { %908 = vmatprep.mubr.msk.f32.mxu0 %vm440_vm1, %v443_v4  ;;  %902 = vmatprep.subr.mxu0 %v447_v3  ;;  %v444_v10 = vld [vmem:[#allocation2 + $0x8] sm:$0xff]  ;;  %v546_v11 = vld [vmem:[%s1102_s17 + $0x20] sm:$0xff]  ;;  %v544_v13 = vld [vmem:[%s1102_s17 + $0x10] sm:$0xff] }
  0x16   : > { %903 = vmatpush3.msra.mxu0 %v447_v3  ;;  %912 = vmatpush3.msra.mxu1 %v549_v6  ;;  %v543_v14 = vld [vmem:[%s1102_s17 + $0x8] sm:$0xff]  ;;  %v542_v15 = vld [vmem:[%s1102_s17] sm:$0xff] }
  0x17   : > { %904 = vmatprep.subr.mxu0 %v446_v5  ;;  %913 = vmatprep.subr.mxu1 %v548_v7  ;;  %v867_v17 = vld [vmem:[%s405_s10] ss:$0 sm:$0xff] }
  0x18   : > { %905 = vmatpush3.msra.mxu0 %v446_v5  ;;  %914 = vmatpush3.msra.mxu1 %v548_v7  ;;  %v872_v33 = vld [vmem:[%s418_s20] ss:$0 sm:$0xff] }
  0x19   : > { %906 = vmatprep.subr.mxu0 %v445_v8  ;;  %915 = vmatprep.subr.mxu1 %v547_v9  ;;  %v873_v61 = vld [vmem:[%s421_s23] ss:$0 sm:$0xff] }
  0x1a   : > { %907 = vmatpush3.msra.mxu0 %v445_v8  ;;  %916 = vmatpush3.msra.mxu1 %v547_v9  ;;  %v541_v24 = vld [vmem:[#allocation3 + $0x8] sm:$0xff]  ;;  %v874_v63 = vld [vmem:[%s424_s27] ss:$0 sm:$0xff] }
  0x1b   : > { %909 = vmatmul.mubr.msk.f32.vlgmr.msra.gmra.mxu0 %vm440_vm1, %v444_v10  ;;  %917 = vmatprep.subr.mxu1 %v546_v11  ;;  %v540_v26 = vld [vmem:[#allocation3] sm:$0xff] }
  0x1c   : > { %918 = vmatpush3.msra.mxu1 %v546_v11 }
  0x1d   : > { %919 = vmatprep.subr.mxu1 %v545_v12 }
  0x1e   : > { %920 = vmatpush3.msra.mxu1 %v545_v12 }
  0x1f   : > { %921 = vmatprep.subr.mxu1 %v544_v13 }
  0x20   : > { %922 = vmatpush3.msra.mxu1 %v544_v13 }
  0x21   : > { %923 = vmatprep.subr.mxu1 %v543_v14 }
  0x22   : > { %924 = vmatpush3.msra.mxu1 %v543_v14 }
  0x23   : > { %925 = vmatprep.subr.mxu1 %v542_v15 }
  0x24   : > { %926 = vmatpush3.msra.mxu1 %v542_v15 }
  0xdb   : > { %v910_v18 = vpop.f32.mrf.mxu0 }
  0xdc   : > { %v535_v19 = vadd.f32 %v910_v18, %v867_v17 }
  0xdd   : > { %v529_v20 = vpop.f32.mrf.mxu0 }
  0xde   : > { %v530_v21 = vadd.f32 %v867_v17, %v529_v20  ;;  %v539_v23 = vmax.f32 %v535_v19, 0.0 }
  0xe0   : > { %v538_v22 = vmax.f32 %v530_v21, 0.0 }
  0xe2   : > { %927 = vmatprep.mubr.msk.f32.mxu1 %vm550_vm2, %v538_v22 }
  0xe3   : > { %928 = vmatmul.mubr.msk.f32.vlgmr.msra.gmra.mxu1 %vm550_vm2, %v539_v23 }
 0x1a3   : > { %v929_v25 = vpop.f32.mrf.mxu1 }
 0x1a4   : > { %v633_v27 = vadd.f32 %v929_v25, %v541_v24 }
 0x1a5   : > { %v623_v28 = vpop.f32.mrf.mxu1 }
 0x1a6   : > { %635 = vst.msk [vmem:[#allocation3 + $0x8] sm:$0xff] %vm440_vm1, %v633_v27  ;;  %v632_v29 = vadd.f32 %v623_v28, %v540_v26 }
 0x1a8   : > { %634 = vst.msk [vmem:[#allocation3] sm:$0xff] %vm440_vm1, %v632_v29 }
 0x1ad   : > { %v640_v30 = vld [vmem:[#allocation3 + $0x8] sm:$0xff] }
 0x1ae   : > { %v642_v31 = vadd.f32 %v640_v30, %v444_v10 }
 0x1af   : > { %v639_v32 = vld [vmem:[#allocation3] sm:$0xff] }
 0x1b0   : > { %v641_v34 = vadd.f32 %v639_v32, %v443_v4  ;;  %v651_v36 = vadd.f32 %v872_v33, %v642_v31 }
 0x1b2   : > { %v650_v35 = vadd.f32 %v872_v33, %v641_v34  ;;  %v662_v40 = vmul.f32 %v651_v36, %v651_v36  ;;  %v655_v41 = vsel %vm440_vm1, %v651_v36, 0.0 }
 0x1b4   : > { %v652_v37 = vsel %vm440_vm1, %v650_v35, 0.0  ;;  %v661_v38 = vmul.f32 %v650_v35, %v650_v35  ;;  %v666_v42 = vsel %vm440_vm1, %v662_v40, 0.0 }
 0x1b5   : > { %653 = vadd.xlane.f32.xlu0 %v652_v37 }
 0x1b6   : > { %v663_v39 = vsel %vm440_vm1, %v661_v38, 0.0 }
 0x1b7   : > { %664 = vadd.xlane.f32.xlu1 %v663_v39 }
 0x1b9   : > { %656 = vadd.xlane.f32.xlu0 %v655_v41 }
 0x1bb   : > { %667 = vadd.xlane.f32.xlu1 %v666_v42 }
 0x23e   : > { %v654_v43 = vpop.xlane.xlu0 %653 }
 0x23f   : > { %v659_v44 = vmul.f32 0.03125, %v654_v43 }
 0x240   : > { %v665_v45 = vpop.xlane.xlu1 %664 }
 0x241   : > { %v671_v46 = vmul.f32 %v659_v44, %v659_v44  ;;  %v669_v47 = vmul.f32 0.03125, %v665_v45  ;;  %v677_v59 = vsub.f32 %v650_v35, %v659_v44 }
 0x242   : > { %v657_v48 = vpop.xlane.xlu0 %656 }
 0x243   : > { %v673_v49 = vsub.f32 %v669_v47, %v671_v46  ;;  %v660_v50 = vmul.f32 0.03125, %v657_v48 }
 0x244   : > { %v668_v51 = vpop.xlane.xlu1 %667 }
 0x245   : > { %v675_v52 = vmax.f32 %v673_v49, 0.0  ;;  %v672_v53 = vmul.f32 %v660_v50, %v660_v50  ;;  %v670_v54 = vmul.f32 0.03125, %v668_v51  ;;  %v678_v1 = vsub.f32 %v651_v36, %v660_v50 }
 0x247   : > { %v679_v55 = vadd.f32 1e-05, %v675_v52  ;;  %v674_v56 = vsub.f32 %v670_v54, %v672_v53 }
 0x249   : > { %964 = vrsqrt.f32 %v679_v55  ;;  %v676_v57 = vmax.f32 %v674_v56, 0.0 }
 0x24b   : > { %v680_v58 = vadd.f32 1e-05, %v676_v57 }
 0x24d   : > { %966 = vrsqrt.f32 %v680_v58 }
 0x256   : > { %v965_v60 = vpop.eup %964 }
 0x257   : > { %v683_v62 = vmul.f32 %v965_v60, %v677_v59 }
 0x259   : > { %v692_v0 = vmul.f32 %v873_v61, %v683_v62 }
 0x25a   : > { %v967_v2 = vpop.eup %966 }
 0x25b   : > { %v701_v3 = vadd.f32 %v874_v63, %v692_v0  ;;  %v684_v4 = vmul.f32 %v967_v2, %v678_v1 }
 0x25d   : > { %703 = vst.msk [vmem:[#allocation2] sm:$0xff] %vm440_vm1, %v701_v3  ;;  %v693_v5 = vmul.f32 %v873_v61, %v684_v4  ;;  %709 = sbr.rel (!%p705_p6) target bundleno = 618 (0x26a), region = 64 }
 0x25f   : > { %v702_v6 = vadd.f32 %v874_v63, %v693_v5 }
 0x261   : > { %704 = vst.msk [vmem:[#allocation2 + $0x8] sm:$0xff] %vm440_vm1, %v702_v6 }
 0x264   : > { %v710_v7 = vld [vmem:[#allocation2] sm:$0xff] }
 0x265   : > { %712 = vst.msk [vmem:[#allocation4] sm:$0xff] %vm440_vm1, %v710_v7 }
 0x268   : > { %v711_v8 = vld [vmem:[#allocation2 + $0x8] sm:$0xff] }
 0x269   : > { %713 = vst.msk [vmem:[#allocation4 + $0x8] sm:$0xff] %vm440_vm1, %v711_v8 }
 0x26a PF: > { %s1201_s27 = sadd.s32 4294967295, %s1018_s26   ;;  %s1021_s21 = smov [#allocation4]  }
 0x26b   : > { %p1169_p7 = scmp.eq.s32.totalorder %s1201_s27, 1  ;;  %s723_s22 = sshll.u32 %s1021_s21, 4  ;;  %s724_s22 = int_to_ptr.vmem [resolvable:$true] %s723_s22 }
 0x26c   : > { %s968_s23 = scalar_lea.vmem %s724_s22, 256  ;;  %p975_p11 = scmp.lt.s32.totalorder %s724_s22, %s724_s22 }
 0x26d   : > { %p969_p8 = scmp.ne.s32.totalorder %s724_s22, %s968_s23  ;;  %p976_p12 = scmp.lt.s32.totalorder %s968_s23, %s968_s23 }
 0x26f   : > { %p970_p9 = pnand %p969_p8, %p1169_p7  ;;  %p977_p13 = por %p976_p12, %p975_p11 }
 0x271   : > { %p971_p10 = pneg %p970_p9 }
 0x273   : > { %p978_p0 = pnand %p977_p13, %p971_p10 }
 0x275   : > { %981 = shalt.err (!%p978_p0)
}
 0x276   : > { %s1022_s24 = smov 128   ;;  %s1023_s8 = smov 8  }
 0x277   : > { %931 = dma.vmem_to_hbm [thread:$0]  (%p1169_p7), %s724_s22, 256, %s1200_s7, [#allocation5], %s1022_s24, %s1022_s24, %s1023_s8  }
 0x278   : > { %1005 = dma.done.wait (%p1169_p7), [#allocation5], 256  }
 0x279   : > { %1007 = vsyncadd (%p1169_p7), [#allocation5], 4294967040 }
 0x27a PF: > { %s18_s26 = sadd.s32 1, %s1018_s26   ;;  %s1203_s24 = smov %s1014_s25 }
 0x27b   : > { %p15_p1 = scmp.ge.s32.totalorder %s18_s26, 4   ;;  %s1204_s25 = smov %s1206_s28 }
 0x27d   :  { %17 = sbr.rel (!%p15_p1) target bundleno = 2 (0x2), region = 110 }
 0x282   :  { %739 = vsyncpa [#allocation5], 1 }
 0x283   :  { %741 = vsyncpa [#allocation5 + $0x1], 1 }

</bundles_post_ra>
